<compile_context>
chip_gen: v7x
topology: tpu7x:2x2x1
jax: 0.10.0
libtpu: 0.0.40
codegen_flags: <defaults>
</compile_context>

<pallas_src>
import functools
import math

import jax
import jax.numpy as jnp
from jax.experimental import pallas as pl
from jax.experimental.pallas import tpu as pltpu

_LANE = 128


def _round_up(x, m):
    return ((x + m - 1) // m) * m


def _cdiv(a, b):
    return (a + b - 1) // b


def _sublane_align(dtype):
    # f32 -> 8 sublanes, bf16 -> 16, int8/fp8 -> 32 (packing along sublanes).
    itemsize = jnp.dtype(dtype).itemsize
    return max(8, 32 // max(itemsize, 1))


def _hw_config():
    """Best-effort TPU generation probe -> tile defaults / VMEM cap / #TCs."""
    vmem_cap = None
    try:
        vmem_cap = int(pltpu.get_tpu_info().vmem_capacity_bytes)
    except Exception:
        vmem_cap = None
    kind = ""
    try:
        kind = jax.devices()[0].device_kind.lower()
    except Exception:
        pass
    if "v7" in kind:
        # 2 TensorCores, 64 MiB VMEM per TC -> moderate tiles, big K.
        return dict(num_tc=2, vmem_cap=vmem_cap or (64 << 20),
                    tm=256, tn=256, tk=1024)
    if "v5" in kind or "v6" in kind:
        # 1 TC, 128 MiB VMEM -> big tiles cut operand re-streaming.
        return dict(num_tc=1, vmem_cap=vmem_cap or (128 << 20),
                    tm=512, tn=512, tk=2048)
    # Unknown generation: conservative budget.
    return dict(num_tc=1, vmem_cap=vmem_cap or (64 << 20),
                tm=256, tn=256, tk=1024)


def _pick_tile(dim, align, tile_max):
    """Tile (multiple of `align`, <= tile_max-ish) minimizing padding of `dim`."""
    aligned = _round_up(dim, align)
    tile_max = _round_up(tile_max, align)
    if aligned <= tile_max:
        return aligned                      # whole dim in one tile
    n_steps = _cdiv(aligned, tile_max)
    return _round_up(_cdiv(aligned, n_steps), align)


def _regression_relu_kernel(x_ref, w_ref, b_ref, o_ref, acc_ref, *,
                            slope_pos, slope_neg):
    k = pl.program_id(2)

    @pl.when(k == 0)
    def _():
        # Fold bias into the accumulator init (broadcast [1, tn] over tm rows).
        acc_ref[...] = jnp.broadcast_to(b_ref[...].astype(jnp.float32),
                                        acc_ref.shape)

    acc_ref[...] += jnp.dot(x_ref[...], w_ref[...],
                            preferred_element_type=jnp.float32)

    @pl.when(k == pl.num_programs(2) - 1)
    def _():
        z = acc_ref[...]
        # PReLU with a single VPU multiply: z * select(slope_pos, slope_neg).
        o_ref[...] = (z * jnp.where(z >= 0.0, slope_pos, slope_neg)).astype(
            o_ref.dtype)


def prepare_params(w, b, *, compute_dtype=jnp.bfloat16):
    """Pad/cast the Linear params once (hoists jnp.pad + cast off the per-call
    path). Returns (w_padded, b_padded, d_out); pass d_out to regression_relu."""
    D_in, D_out = w.shape
    K_p = _round_up(D_in, _LANE)
    N_p = _round_up(D_out, _LANE)
    w_p = jnp.pad(w.astype(compute_dtype), ((0, K_p - D_in), (0, N_p - D_out)))
    b_p = jnp.pad(b.astype(jnp.float32), (0, N_p - D_out))
    return w_p, b_p, D_out


def regression_relu(x, w, b, slope_positive=1.0, slope_negative=0.25, *,
                    compute_dtype=jnp.bfloat16, d_out=None,
                    tm=None, tn=None, tk=None):
    """PReLU(x @ w + b) with fixed slopes, matching the PyTorch module.

    x: [B, D_in]; w: [D_in, D_out] (PyTorch weight transposed); b: [D_out].
    `w`/`b` may be pre-padded via prepare_params() (then pass the true d_out).
    compute_dtype=jnp.bfloat16 (default) uses the native MXU rate with f32
    accumulation; compute_dtype=None keeps full f32 compute.
    """
    B, D_in = x.shape
    D_out = w.shape[1] if d_out is None else d_out
    out_dtype = x.dtype

    hw = _hw_config()
    tm = hw["tm"] if tm is None else tm
    tn = hw["tn"] if tn is None else tn
    tk = hw["tk"] if tk is None else tk

    if compute_dtype is None:
        compute_dtype = x.dtype
    if x.dtype != compute_dtype:
        x = x.astype(compute_dtype)
    if w.dtype != compute_dtype:
        w = w.astype(compute_dtype)

    in_item = jnp.dtype(compute_dtype).itemsize
    out_item = jnp.dtype(out_dtype).itemsize
    # Sublane tiling must respect the packed compute dtype AND the output dtype.
    sub = max(_sublane_align(compute_dtype), _sublane_align(out_dtype))

    # Tiles that minimize pad waste; whole dim in one tile when it fits.
    tm = _pick_tile(B, sub, tm)
    tn = _pick_tile(D_out, _LANE, tn)
    tk = _pick_tile(D_in, _LANE, tk)

    B_p = _round_up(_round_up(B, sub), tm)
    K_p = _round_up(_round_up(D_in, _LANE), tk)
    N_p = _round_up(_round_up(D_out, _LANE), tn)

    # On v7x, make sure the parallel (M,N) grid has >=2 tiles so both
    # TensorCores get work; no effect on single-TC v5e/v6e.
    if hw["num_tc"] >= 2 and (B_p // tm) * (N_p // tn) < 2 and N_p > _LANE:
        tn = _round_up(N_p // 2, _LANE)
        N_p = _round_up(N_p, tn)

    # Pad only when needed (skips jnp.pad entirely for pre-padded params).
    if (B_p, K_p) != (B, D_in):
        x = jnp.pad(x, ((0, B_p - B), (0, K_p - D_in)))
    if w.shape != (K_p, N_p):
        w = jnp.pad(w, ((0, K_p - w.shape[0]), (0, N_p - w.shape[1])))
    b2 = b.astype(jnp.float32).reshape(1, -1)
    if b2.shape[1] != N_p:
        b2 = jnp.pad(b2, ((0, 0), (0, N_p - b2.shape[1])))

    grid_m, grid_n, grid_k = B_p // tm, N_p // tn, K_p // tk
    grid = (grid_m, grid_n, grid_k)

    kernel = functools.partial(
        _regression_relu_kernel,
        slope_pos=float(slope_positive),
        slope_neg=float(slope_negative),
    )

    # HBM traffic, including operand re-streaming across the grid.
    bytes_accessed = (B_p * K_p * in_item * grid_n
                      + K_p * N_p * in_item * grid_m
                      + N_p * 4 * grid_m
                      + B_p * N_p * out_item)
    cost = pl.CostEstimate(flops=2 * B_p * K_p * N_p,
                           transcendentals=0,
                           bytes_accessed=bytes_accessed)

    # VMEM: double-buffered x/w/b/out tiles + the f32 accumulator, 2x headroom,
    # capped at ~85% of physical VMEM (leaves compiler-scratch headroom on v7x).
    vmem_bytes = (2 * (tm * tk + tk * tn) * in_item
                  + 2 * tn * 4
                  + 2 * tm * tn * out_item
                  + tm * tn * 4)
    vmem_limit = int(min(max(2 * vmem_bytes, 32 << 20),
                         int(0.85 * hw["vmem_cap"])))

    vspace = pltpu.MemorySpace.VMEM

    out_p = pl.pallas_call(
        kernel,
        out_shape=jax.ShapeDtypeStruct((B_p, N_p), out_dtype),
        grid_spec=pltpu.PrefetchScalarGridSpec(
            num_scalar_prefetch=0,
            grid=grid,
            in_specs=[
                pl.BlockSpec((tm, tk), lambda i, j, k: (i, k),
                             memory_space=vspace),
                pl.BlockSpec((tk, tn), lambda i, j, k: (k, j),
                             memory_space=vspace),
                pl.BlockSpec((1, tn), lambda i, j, k: (0, j),
                             memory_space=vspace),
            ],
            out_specs=pl.BlockSpec((tm, tn), lambda i, j, k: (i, j),
                                   memory_space=vspace),
            scratch_shapes=[pltpu.VMEM((tm, tn), jnp.float32)],
        ),
        compiler_params=pltpu.CompilerParams(
            dimension_semantics=("parallel", "parallel", "arbitrary"),
            vmem_limit_bytes=vmem_limit,
        ),
        cost_estimate=cost,
    )(x, w, b2)

    return out_p[:B, :D_out]


def init_params(key, input_dim, output_dim, cb=0.0, cw=1.0):
    """Deterministic init matching init_weights(cb, cw):
    W ~ N(0, cw/input_dim), b ~ N(0, cb) (cb=0 -> zeros)."""
    kw, kb = jax.random.split(key)
    w = jax.random.normal(kw, (input_dim, output_dim), jnp.float32) * math.sqrt(
        cw / input_dim)
    b = jax.random.normal(kb, (output_dim,), jnp.float32) * math.sqrt(cb)
    return w, b


if __name__ == "__main__":
    key = jax.random.PRNGKey(0)
    k_x, k_p = jax.random.split(key)

    B, D_in, D_out = 8, 32, 16
    x = jax.random.normal(k_x, (B, D_in), jnp.float32)
    w, b = init_params(k_p, D_in, D_out, cb=0.0, cw=1.0)

    slope_positive, slope_negative = 1.0, 0.25  # as set via set_slopes()

    # Default fast path: bf16 MXU inputs, f32 accumulation + epilogue.
    out = regression_relu(x, w, b, slope_positive, slope_negative)
    out = jax.block_until_ready(out)
    assert out.shape == (B, D_out)

    # Reference with the same bf16-cast inputs (matches kernel numerics).
    xb = x.astype(jnp.bfloat16).astype(jnp.float32)
    wb = w.astype(jnp.bfloat16).astype(jnp.float32)
    z_bf = xb @ wb + b
    ref_bf = jnp.where(z_bf >= 0, slope_positive * z_bf, slope_negative * z_bf)
    assert jnp.allclose(out, ref_bf, atol=1e-4, rtol=1e-4)

    # Loose sanity check against the pure-f32 reference.
    z32 = x @ w + b
    ref32 = jnp.where(z32 >= 0, slope_positive * z32, slope_negative * z32)
    assert jnp.allclose(out, ref32, atol=5e-2, rtol=5e-2)

    # f32 opt-in path matches the f32 reference tightly.
    out_f32 = jax.block_until_ready(
        regression_relu(x, w, b, slope_positive, slope_negative,
                        compute_dtype=None))
    assert jnp.allclose(out_f32, ref32, atol=1e-5, rtol=1e-5)

    print("KERNEL_OK")
</pallas_src>

<mosaic_0001>
module attributes {stable_mosaic.version = 11 : i64} {
  func.func @_regression_relu_kernel(%arg0: i32, %arg1: i32, %arg2: i32, %arg3: memref<16x128xbf16, #tpu.memory_space<vmem>>, %arg4: memref<128x128xbf16, #tpu.memory_space<vmem>>, %arg5: memref<1x128xf32, #tpu.memory_space<vmem>>, %arg6: memref<16x128xf32, #tpu.memory_space<vmem>>, %arg7: memref<16x128xf32, #tpu.memory_space<vmem>>) attributes {dimension_semantics = [#tpu.dimension_semantics<parallel>, #tpu.dimension_semantics<parallel>, #tpu.dimension_semantics<arbitrary>], iteration_bounds = array<i64: 1, 1, 1>, scalar_prefetch = 0 : i64, scratch_operands = 1 : i64, tpu.core_type = #tpu.core_type<tc>, window_params = [{transform_indices = @transform_0, window_bounds = array<i64: 16, 128>}, {transform_indices = @transform_1, window_bounds = array<i64: 128, 128>}, {transform_indices = @transform_2, window_bounds = array<i64: 1, 128>}, {transform_indices = @transform_3, window_bounds = array<i64: 16, 128>}]} {
    %c0_i32 = arith.constant 0 : i32
    %0 = arith.cmpi eq, %arg2, %c0_i32 : i32
    %1 = arith.extui %0 : i1 to i32
    %c0_i32_0 = arith.constant 0 : i32
    %2 = arith.cmpi ne, %1, %c0_i32_0 : i32
    scf.if %2 {
      %c0_10 = arith.constant 0 : index
      %c0_11 = arith.constant 0 : index
      %12 = vector.load %arg5[%c0_10, %c0_11] : memref<1x128xf32, #tpu.memory_space<vmem>>, vector<1x128xf32>
      %13 = vector.shape_cast %12 : vector<1x128xf32> to vector<1x128xf32>
      %14 = vector.broadcast %13 : vector<1x128xf32> to vector<16x128xf32>
      %c0_12 = arith.constant 0 : index
      %c0_13 = arith.constant 0 : index
      %15 = vector.load %arg7[%c0_12, %c0_13] : memref<16x128xf32, #tpu.memory_space<vmem>>, vector<16x128xf32>
      tpu.vector_store %arg7[%c0_12, %c0_13], %14 {strides = array<i32>} : memref<16x128xf32, #tpu.memory_space<vmem>>, vector<16x128xf32>,
    } else {
    }
    %c0 = arith.constant 0 : index
    %c0_1 = arith.constant 0 : index
    %3 = vector.load %arg7[%c0, %c0_1] : memref<16x128xf32, #tpu.memory_space<vmem>>, vector<16x128xf32>
    %c0_2 = arith.constant 0 : index
    %c0_3 = arith.constant 0 : index
    %4 = vector.load %arg3[%c0_2, %c0_3] : memref<16x128xbf16, #tpu.memory_space<vmem>>, vector<16x128xbf16>
    %c0_4 = arith.constant 0 : index
    %c0_5 = arith.constant 0 : index
    %5 = vector.load %arg4[%c0_4, %c0_5] : memref<128x128xbf16, #tpu.memory_space<vmem>>, vector<128x128xbf16>
    %cst = arith.constant dense<0.000000e+00> : vector<16x128xf32>
    %6 = tpu.matmul %4, %5, %cst {dimension_numbers = #tpu.dot_dimension_numbers<[1], [0], [0], [1], [0, 0, 1, 1], [], []>} : vector<16x128xbf16>, vector<128x128xbf16>, vector<16x128xf32> -> vector<16x128xf32>
    %7 = arith.addf %3, %6 : vector<16x128xf32>
    %c0_6 = arith.constant 0 : index
    %c0_7 = arith.constant 0 : index
    %8 = vector.load %arg7[%c0_6, %c0_7] : memref<16x128xf32, #tpu.memory_space<vmem>>, vector<16x128xf32>
    tpu.vector_store %arg7[%c0_6, %c0_7], %7 {strides = array<i32>} : memref<16x128xf32, #tpu.memory_space<vmem>>, vector<16x128xf32>,
    %c0_i32_8 = arith.constant 0 : i32
    %9 = arith.cmpi eq, %arg2, %c0_i32_8 : i32
    %10 = arith.extui %9 : i1 to i32
    %c0_i32_9 = arith.constant 0 : i32
    %11 = arith.cmpi ne, %10, %c0_i32_9 : i32
    scf.if %11 {
      %c0_10 = arith.constant 0 : index
      %c0_11 = arith.constant 0 : index
      %12 = vector.load %arg7[%c0_10, %c0_11] : memref<16x128xf32, #tpu.memory_space<vmem>>, vector<16x128xf32>
      %cst_12 = arith.constant 0.000000e+00 : f32
      %13 = vector.broadcast %cst_12 : f32 to vector<16x128xf32>
      %14 = arith.cmpf oge, %12, %13 : vector<16x128xf32>
      %cst_13 = arith.constant 1.000000e+00 : f32
      %cst_14 = arith.constant 2.500000e-01 : f32
      %15 = vector.broadcast %cst_13 : f32 to vector<16x128xf32>
      %16 = vector.broadcast %cst_14 : f32 to vector<16x128xf32>
      %17 = arith.select %14, %15, %16 : vector<16x128xi1>, vector<16x128xf32>
      %18 = arith.mulf %12, %17 : vector<16x128xf32>
      %c0_15 = arith.constant 0 : index
      %c0_16 = arith.constant 0 : index
      %19 = vector.load %arg6[%c0_15, %c0_16] : memref<16x128xf32, #tpu.memory_space<vmem>>, vector<16x128xf32>
      tpu.vector_store %arg6[%c0_15, %c0_16], %18 {strides = array<i32>} : memref<16x128xf32, #tpu.memory_space<vmem>>, vector<16x128xf32>,
    } else {
    }
    return
  }
  func.func @transform_0(%arg0: i32, %arg1: i32, %arg2: i32) -> (i32, i32) {
    %c0_i32 = arith.constant 0 : i32
    return %arg0, %arg2 : i32, i32
  }
  func.func @transform_1(%arg0: i32, %arg1: i32, %arg2: i32) -> (i32, i32) {
    %c0_i32 = arith.constant 0 : i32
    return %arg2, %arg1 : i32, i32
  }
  func.func @transform_2(%arg0: i32, %arg1: i32, %arg2: i32) -> (i32, i32) {
    %c0_i32 = arith.constant 0 : i32
    %c0_i32_0 = arith.constant 0 : i32
    return %c0_i32, %arg1 : i32, i32
  }
  func.func @transform_3(%arg0: i32, %arg1: i32, %arg2: i32) -> (i32, i32) {
    %c0_i32 = arith.constant 0 : i32
    return %arg0, %arg1 : i32, i32
  }
}

</mosaic_0001>

<bundles_post_ra>
// kernel: tpu_custom_call.1
= control target key start
LH: loop header
LB: loop body
LE: loop exit
PB: predicated region body
PF: predicated region fallthrough
CT: control target
= control target key end

     0   :  { %8 = vsyncpa [#allocation4], 0  ;;  %s406_s0 = inlined_call_operand.hbm [shape: bf16[16,128], index: 0, kind: input, shape index: {}]   ;;  %s407_s1 = inlined_call_operand.hbm [shape: bf16[128,128], index: 1, kind: input, shape index: {}]   ;;  %s408_s2 = inlined_call_operand.vmem [shape: f32[1,128], index: 2, kind: input, shape index: {}]   ;;  %s409_s3 = inlined_call_operand.hbm [shape: f32[16,128], index: 3, kind: output, shape index: {}]  }
   0x1   :  { %9 = vsyncpa [#allocation7], 0 }
   0x2   :  { %10 = vsyncpa [#allocation5], 0  ;;  %s337_s12 = smov [#allocation3]   ;;  %s265_s16 = scalar_lea.hbm %s406_s0, 128 }
   0x3   :  { %s16_s13 = sshll.u32 %s337_s12, 4  ;;  %p266_p0 = scmp.ne.s32.totalorder %s406_s0, %s265_s16  ;;  %s17_s13 = int_to_ptr.vmem [resolvable:$true] %s16_s13 }
   0x4   :  { %p269_p1 = scmp.lt.u32.totalorder %s265_s16, %s406_s0 }
   0x6   :  { %p271_p2 = pnand %p269_p1, %p266_p0 }
   0x8   :  { %274 = shalt.err (!%p271_p2)
}
   0x9   :  { %s275_s21 = scalar_lea.vmem %s17_s13, 128  ;;  %p280_p4 = scmp.lt.s32.totalorder %s17_s13, %s17_s13 }
   0xa   :  { %p276_p3 = scmp.ne.s32.totalorder %s17_s13, %s275_s21  ;;  %p281_p5 = scmp.lt.s32.totalorder %s275_s21, %s275_s21 }
   0xc   :  { %p282_p6 = por %p281_p5, %p280_p4 }
   0xe   :  { %p283_p7 = pnand %p282_p6, %p276_p3 }
  0x10   :  { %286 = shalt.err (!%p283_p7)
}
  0x11   :  { %s338_s22 = smov 64   ;;  %s339_s23 = smov 4  }
  0x12   :  { %22 = dma.hbm_to_vmem [thread:$0]  %s406_s0, 128, %s17_s13, [#allocation4], %s338_s22, %s338_s22, %s339_s23  }
  0x13   :  { %s340_s26 = smov [#allocation6]   ;;  %s287_s30 = scalar_lea.hbm %s407_s1, 1024 }
  0x14   :  { %s28_s27 = sshll.u32 %s340_s26, 4  ;;  %p288_p8 = scmp.ne.s32.totalorder %s407_s1, %s287_s30  ;;  %s29_s27 = int_to_ptr.vmem [resolvable:$true] %s28_s27 }
  0x15   :  { %p291_p9 = scmp.lt.u32.totalorder %s287_s30, %s407_s1 }
  0x17   :  { %p293_p10 = pnand %p291_p9, %p288_p8 }
  0x19   :  { %296 = shalt.err (!%p293_p10)
}
  0x1a   :  { %s297_s8 = scalar_lea.vmem %s29_s27, 1024  ;;  %p302_p12 = scmp.lt.s32.totalorder %s29_s27, %s29_s27 }
  0x1b   :  { %p298_p11 = scmp.ne.s32.totalorder %s29_s27, %s297_s8  ;;  %p303_p13 = scmp.lt.s32.totalorder %s297_s8, %s297_s8 }
  0x1d   :  { %p304_p0 = por %p303_p13, %p302_p12 }
  0x1f   :  { %p305_p1 = pnand %p304_p0, %p298_p11 }
  0x21   :  { %308 = shalt.err (!%p305_p1)
}
  0x22   :  { %34 = dma.hbm_to_vmem [thread:$0]  %s407_s1, 1024, %s29_s27, [#allocation7], %s338_s22, %s338_s22, %s339_s23  }
  0x23   :  { %331 = dma.done.wait [#allocation4], 128  }
  0x24   :  { %332 = vsyncadd [#allocation4], 4294967168 }
  0x25   :  { %333 = dma.done.wait [#allocation7], 1024  }
  0x26   :  { %334 = vsyncadd [#allocation7], 4294966272  ;;  %v341_v0 = vmov 0.0   ;;  %vm342_vm0 = vmmov 0   ;;  %v256_v1 = vld [vmem:[#allocation6] sm:$0xff]   ;;  %v257_v2 = vld [vmem:[#allocation6 + $0x8] sm:$0xff]  }
  0x27   :  { %226 = vmatprep.subr.bf16.mxu0 %v341_v0  ;;  %242 = vmatprep.mubr.msk.bf16.mxu0 %vm342_vm0, %v341_v0  ;;  %v258_v3 = vld [vmem:[#allocation6 + $0x10] sm:$0xff]   ;;  %v259_v4 = vld [vmem:[#allocation6 + $0x18] sm:$0xff]   ;;  %v260_v5 = vld [vmem:[#allocation6 + $0x20] sm:$0xff]   ;;  %s343_s11 = smov [#allocation8]   ;;  %v344_v17 = vmov 0.25  }
  0x28   :  { %227 = vmatpush3.bf16.msra.mxu0 %v256_v1  ;;  %v261_v6 = vld [vmem:[#allocation6 + $0x28] sm:$0xff]   ;;  %v262_v7 = vld [vmem:[#allocation6 + $0x30] sm:$0xff]   ;;  %v263_v8 = vld [vmem:[#allocation6 + $0x38] sm:$0xff]   ;;  %s194_s12 = sshll.u32 %s343_s11, 4  ;;  %s195_s12 = int_to_ptr.vmem [resolvable:$true] %s194_s12 }
  0x29   :  { %228 = vmatprep.subr.bf16.mxu0 %v341_v0  ;;  %v264_v9 = vld [vmem:[#allocation3] sm:$0xff]   ;;  %s309_s13 = scalar_lea.vmem %s195_s12, 256  ;;  %p314_p3 = scmp.lt.s32.totalorder %s195_s12, %s195_s12 }
  0x2a   :  { %v207_v10 = vld [vmem:[%s408_s2] ss:$0 sm:$0xff]  ;;  %p310_p2 = scmp.ne.s32.totalorder %s195_s12, %s309_s13  ;;  %p315_p4 = scmp.lt.s32.totalorder %s309_s13, %s309_s13 }
  0x2c   :  { %229 = vmatpush3.bf16.msra.mxu0 %v257_v2  ;;  %p316_p5 = por %p315_p4, %p314_p3 }
  0x2d   :  { %230 = vmatprep.subr.bf16.mxu0 %v341_v0 }
  0x2e   :  { %p317_p6 = pnand %p316_p5, %p310_p2 }
  0x30   :  { %231 = vmatpush3.bf16.msra.mxu0 %v258_v3 }
  0x31   :  { %232 = vmatprep.subr.bf16.mxu0 %v341_v0 }
  0x34   :  { %233 = vmatpush3.bf16.msra.mxu0 %v259_v4 }
  0x35   :  { %234 = vmatprep.subr.bf16.mxu0 %v341_v0 }
  0x38   :  { %235 = vmatpush3.bf16.msra.mxu0 %v260_v5 }
  0x39   :  { %236 = vmatprep.subr.bf16.mxu0 %v341_v0 }
  0x3c   :  { %237 = vmatpush3.bf16.msra.mxu0 %v261_v6 }
  0x3d   :  { %238 = vmatprep.subr.bf16.mxu0 %v341_v0 }
  0x40   :  { %239 = vmatpush3.bf16.msra.mxu0 %v262_v7 }
  0x41   :  { %240 = vmatprep.subr.bf16.mxu0 %v341_v0 }
  0x44   :  { %241 = vmatpush3.bf16.msra.mxu0 %v263_v8 }
  0x47   :  { %243 = vmatmul.mubr.bf16.vlgmr.msra.gmra.mrb[0].mxu0 %v264_v9 }
 0x11a   :  { %v165_v11 = vpop.f32.mrb[0].mxu0 }
 0x11b   :  { %v172_v12 = vadd.f32 %v207_v10, %v165_v11  ;;  %v244_v13 = vpop.f32.mrb[1].mxu0 }
 0x11c   :  { %v168_v14 = vpop.f32.mrb[2].mxu0 }
 0x11d   :  { %vm181_vm1 = vcmp.ge.f32.partialorder %v172_v12, 0.0  ;;  %v173_v15 = vadd.f32 %v207_v10, %v168_v14  ;;  %v245_v16 = vpop.f32.mrb[3].mxu0 }
 0x11e   :  { %v183_v18 = vsel %vm181_vm1, 1.0, %v344_v17 }
 0x11f   :  { %v185_v19 = vmul.f32 %v183_v18, %v172_v12  ;;  %vm182_vm2 = vcmp.ge.f32.partialorder %v173_v15, 0.0 }
 0x120   :  { %v184_v20 = vsel %vm182_vm2, 1.0, %v344_v17 }
 0x121   :  { %187 = vst [vmem:[#allocation8] sm:$0xff] %v185_v19  ;;  %v186_v21 = vmul.f32 %v184_v20, %v173_v15 }
 0x123   :  { %188 = vst [vmem:[#allocation8 + $0x8] sm:$0xff] %v186_v21 }
 0x124   :  { %320 = shalt.err (!%p317_p6)
}
 0x125   :  { %s321_s15 = scalar_lea.hbm %s409_s3, 256 }
 0x126   :  { %p322_p7 = scmp.ne.s32.totalorder %s409_s3, %s321_s15  ;;  %p325_p8 = scmp.lt.u32.totalorder %s321_s15, %s409_s3 }
 0x128   :  { %p327_p9 = pnand %p325_p8, %p322_p7 }
 0x12a   :  { %330 = shalt.err (!%p327_p9)
}
 0x12b   :  { %s345_s20 = smov 128   ;;  %s346_s21 = smov 8  }
 0x12c   :  { %200 = dma.vmem_to_hbm [thread:$0]  %s195_s12, 256, %s409_s3, [#allocation5], %s345_s20, %s345_s20, %s346_s21  }
 0x12d   :  { %335 = dma.done.wait [#allocation5], 256  }
 0x12e   :  { %336 = vsyncadd [#allocation5], 4294967040 }
 0x12f   :  { %204 = vsyncpa [#allocation4], 1 }
 0x130   :  { %205 = vsyncpa [#allocation7], 1 }
 0x131   :  { %206 = vsyncpa [#allocation5], 1 }

</bundles_post_ra>
